<compile_context>
chip_gen: v7x
topology: tpu7x:2x2x1
jax: 0.10.0
libtpu: 0.0.40
codegen_flags: <defaults>
</compile_context>

<pallas_src>
import functools

import jax
import jax.numpy as jnp
from jax import lax
from jax.experimental import pallas as pl
from jax.experimental.pallas import tpu as pltpu


def _round_up(x: int, m: int) -> int:
    return (x + m - 1) // m * m


def _pad2d(a, shape):
    return jnp.pad(a, [(0, s - d) for d, s in zip(a.shape, shape)])


def _tpu_generation():
    """Best-effort TPU generation tag: 'v5' / 'v6' / 'v7' / None."""
    try:
        kind = jax.devices()[0].device_kind.lower()
    except Exception:
        return None
    for tag in ("v7", "v6", "v5"):
        if tag in kind:
            return tag
    return None


def mlp_kernel(x_ref, w1_ref, b1_ref, w2_ref, b2_ref, w3_ref, b3_ref, o_ref,
               *, act_dtype):
    """Fused 3-layer MLP; batch ends up on the lane axis inside the kernel.

    x_ref:  (Bt, Dp)  bf16  -- one batch tile of x in natural layout
    w1_ref: (Hp, Dp)  bf16  -- fc1.weight (PyTorch [out, in] layout), resident
    b1_ref: (Hp, 1)   f32
    w2_ref: (Hp, Hp)  bf16  -- fc2.weight, resident
    b2_ref: (Hp, 1)   f32
    w3_ref: (Hp, 1)   f32   -- fc3.weight as a column, resident
    b3_ref: (1,)      f32   -- SMEM scalar
    o_ref:  (1, Bt)   f32   -- lane-dense output row
    """
    # fc1: contract W1 (Hp, Dp) and x (Bt, Dp) on their feature dim -> (Hp, Bt),
    # i.e. the transposed activation, directly on the MXU with f32 accumulation.
    h1 = lax.dot_general(
        w1_ref[...], x_ref[...],
        dimension_numbers=(((1,), (1,)), ((), ())),
        preferred_element_type=jnp.float32,
    ) + b1_ref[...]
    # tanh in bf16 on v6e/v7x (bf16 EUP path), f32 on v5e.
    h1 = jnp.tanh(h1.astype(act_dtype))

    # fc2 + tanh (operands re-quantized to the MXU dtype only for the matmul).
    h2 = jnp.dot(w2_ref[...], h1.astype(w2_ref.dtype),
                 preferred_element_type=jnp.float32) + b2_ref[...]
    h2 = jnp.tanh(h2.astype(act_dtype))

    # fc3 has a single output feature: VPU multiply + XLU sublane reduce (f32)
    # instead of a 1-column MXU matmul; result is already lane-dense.
    y = jnp.sum(h2.astype(jnp.float32) * w3_ref[...], axis=0, keepdims=True) \
        + b3_ref[0]
    o_ref[...] = y.astype(o_ref.dtype)


def _pick_batch_tile(B: int, gen) -> int:
    if B >= 1024:
        return 512
    if B >= 512:
        return 256
    # 128-aligned lanes -> unmasked vector stores on the (1, Bt) output row.
    tile = _round_up(B, 128)
    # v7x has 2 TensorCores: make sure the "parallel" batch axis has >=2 steps
    # once the batch is big enough to split.
    if gen == "v7" and B >= 256:
        tile = _round_up(pl.cdiv(B, 2), 128)
    return tile


def _neural_net_forward_pallas(x, params, *, batch_tile=None,
                               mxu_dtype=jnp.bfloat16):
    w1, b1 = params["w1"], params["b1"]   # (H, D), (H,)  -- PyTorch nn.Linear layout
    w2, b2 = params["w2"], params["b2"]   # (H, H), (H,)
    w3, b3 = params["w3"], params["b3"]   # (1, H), (1,)

    B, d_in = x.shape
    d_h = w1.shape[0]
    gen = _tpu_generation()

    # Pad feature dims to the 128-lane width; pick the batch tile.
    Dp = _round_up(d_in, 128)
    Hp = _round_up(d_h, 128)
    if batch_tile is None:
        batch_tile = _pick_batch_tile(B, gen)
    Bp = _round_up(B, batch_tile)
    grid = (Bp // batch_tile,)

    # bf16 tanh only where the EUP/VPU have a bf16 path (v6e/v7x); f32 elsewhere.
    act_dtype = jnp.bfloat16 if gen in ("v6", "v7") else jnp.float32
    # Generation-aware VMEM budget: v5e/v6e have 128 MiB physical, v7x only 64 MiB.
    vmem_limit = (96 if gen in ("v5", "v6") else 48) * 1024 * 1024

    f32 = jnp.float32
    # Natural (B, D) layout: no wrapper-side transpose pass over x; the cast+pad
    # fuse into a single XLA op.
    x_p = _pad2d(x.astype(mxu_dtype), (Bp, Dp))
    w1_p = _pad2d(w1, (Hp, Dp)).astype(mxu_dtype)
    w2_p = _pad2d(w2, (Hp, Hp)).astype(mxu_dtype)
    b1_p = _pad2d(b1.reshape(-1, 1).astype(f32), (Hp, 1))
    b2_p = _pad2d(b2.reshape(-1, 1).astype(f32), (Hp, 1))
    w3_p = _pad2d(w3.reshape(-1, 1).astype(f32), (Hp, 1))    # fc3 weight as column
    b3_s = jnp.asarray(b3, f32).reshape((1,))

    # Constant index_map + single buffering: fetched once, resident in VMEM, and
    # no second pipeline buffer allocated for data that never changes.
    def resident(shape):
        return pl.BlockSpec(shape, lambda i: (0, 0), pipeline_mode=pl.Buffered(1))

    kernel = functools.partial(mlp_kernel, act_dtype=act_dtype)

    out = pl.pallas_call(
        kernel,
        out_shape=jax.ShapeDtypeStruct((1, Bp), f32),
        grid_spec=pltpu.PrefetchScalarGridSpec(
            num_scalar_prefetch=0,
            grid=grid,
            in_specs=[
                pl.BlockSpec((batch_tile, Dp), lambda i: (i, 0)),    # x batch tile
                resident((Hp, Dp)),                                  # W1
                resident((Hp, 1)),                                   # b1
                resident((Hp, Hp)),                                  # W2
                resident((Hp, 1)),                                   # b2
                resident((Hp, 1)),                                   # w3 column
                pl.BlockSpec(memory_space=pltpu.MemorySpace.SMEM),   # b3 scalar
            ],
            out_specs=pl.BlockSpec((1, batch_tile), lambda i: (0, i)),
        ),
        compiler_params=pltpu.CompilerParams(
            dimension_semantics=("parallel",),
            vmem_limit_bytes=vmem_limit,
        ),
    )(x_p, w1_p, b1_p, w2_p, b2_p, w3_p, b3_s)

    return out[0, :B].reshape(B, 1)


def reference_forward(x, params):
    """Pure-JAX (XLA) forward pass with exact nn.Linear semantics, f32 throughout."""
    h1 = jnp.tanh(x @ params["w1"].T + params["b1"])
    h2 = jnp.tanh(h1 @ params["w2"].T + params["b2"])
    return h2 @ params["w3"].T + params["b3"]


def neural_net_forward(x, params, *, use_pallas=None, batch_tile=None,
                       mxu_dtype=jnp.bfloat16):
    """Forward pass of `neural_net` (fc1 -> tanh -> fc2 -> tanh -> fc3)."""
    if use_pallas is None:
        # Tiny problems: pallas_call launch/pipeline cost exceeds the whole compute;
        # let XLA fuse the three gemms instead. Kernel path for realistic sizes.
        use_pallas = x.shape[0] * params["w2"].shape[0] >= 64 * 128
    if not use_pallas:
        return reference_forward(x, params)
    return _neural_net_forward_pallas(x, params, batch_tile=batch_tile,
                                      mxu_dtype=mxu_dtype)


def init_params(key, input_dim, hidden_dim):
    """Xavier-uniform weights / zero biases in native PyTorch nn.Linear layout."""
    def xavier(k, fan_out, fan_in):
        limit = jnp.sqrt(6.0 / (fan_in + fan_out))
        return jax.random.uniform(k, (fan_out, fan_in), jnp.float32,
                                  minval=-limit, maxval=limit)

    k1, k2, k3 = jax.random.split(key, 3)
    return {
        "w1": xavier(k1, hidden_dim, input_dim),   # == torch fc1.weight
        "b1": jnp.zeros((hidden_dim,), jnp.float32),
        "w2": xavier(k2, hidden_dim, hidden_dim),  # == torch fc2.weight
        "b2": jnp.zeros((hidden_dim,), jnp.float32),
        "w3": xavier(k3, 1, hidden_dim),           # == torch fc3.weight
        "b3": jnp.zeros((1,), jnp.float32),
    }


if __name__ == "__main__":
    key = jax.random.PRNGKey(0)
    kx, kp, kx2, kp2 = jax.random.split(key, 4)

    # Small shapes implied by the module spec (hidden_layers is unused by forward()).
    input_dim, hidden_dim, hidden_layers = 16, 32, 2
    batch = 16
    x = jax.random.normal(kx, (batch, input_dim), jnp.float32)
    params = init_params(kp, input_dim, hidden_dim)

    # Force the Pallas path to exercise the kernel even at this tiny size.
    out = jax.block_until_ready(neural_net_forward(x, params, use_pallas=True))
    ref = reference_forward(x, params)
    assert out.shape == (batch, 1)
    # Tolerance covers bf16 MXU operands (+ bf16 tanh on v6e/v7x) vs f32 reference.
    assert jnp.allclose(out, ref, atol=7.5e-2, rtol=5e-2), \
        float(jnp.max(jnp.abs(out - ref)))

    # Also exercise the multi-tile grid path at a more realistic size.
    x2 = jax.random.normal(kx2, (1024, 64), jnp.float32)
    params2 = init_params(kp2, 64, 128)
    out2 = jax.block_until_ready(neural_net_forward(x2, params2, use_pallas=True))
    ref2 = reference_forward(x2, params2)
    assert out2.shape == (1024, 1)
    assert jnp.allclose(out2, ref2, atol=7.5e-2, rtol=5e-2), \
        float(jnp.max(jnp.abs(out2 - ref2)))

    print("KERNEL_OK")
</pallas_src>

<mosaic_0001>
module attributes {stable_mosaic.version = 11 : i64} {
  func.func @mlp_kernel(%arg0: i32, %arg1: memref<128x128xbf16, #tpu.memory_space<vmem>>, %arg2: memref<128x128xbf16, #tpu.memory_space<vmem>>, %arg3: memref<128x1xf32, #tpu.memory_space<vmem>>, %arg4: memref<128x128xbf16, #tpu.memory_space<vmem>>, %arg5: memref<128x1xf32, #tpu.memory_space<vmem>>, %arg6: memref<128x1xf32, #tpu.memory_space<vmem>>, %arg7: memref<1xf32, #tpu.memory_space<smem>>, %arg8: memref<1x128xf32, #tpu.memory_space<vmem>>) attributes {dimension_semantics = [#tpu.dimension_semantics<parallel>], iteration_bounds = array<i64: 1>, scalar_prefetch = 0 : i64, scratch_operands = 0 : i64, tpu.core_type = #tpu.core_type<tc>, window_params = [{transform_indices = @transform_0, window_bounds = array<i64: 128, 128>}, {pipeline_mode = #tpu.pipeline_mode<synchronous>, transform_indices = @transform_1, window_bounds = array<i64: 128, 128>}, {pipeline_mode = #tpu.pipeline_mode<synchronous>, transform_indices = @transform_2, window_bounds = array<i64: 128, 1>}, {pipeline_mode = #tpu.pipeline_mode<synchronous>, transform_indices = @transform_3, window_bounds = array<i64: 128, 128>}, {pipeline_mode = #tpu.pipeline_mode<synchronous>, transform_indices = @transform_4, window_bounds = array<i64: 128, 1>}, {pipeline_mode = #tpu.pipeline_mode<synchronous>, transform_indices = @transform_5, window_bounds = array<i64: 128, 1>}, {transform_indices = @transform_6, window_bounds = array<i64: 1>}, {transform_indices = @transform_7, window_bounds = array<i64: 1, 128>}]} {
    %c0 = arith.constant 0 : index
    %c0_0 = arith.constant 0 : index
    %0 = vector.load %arg2[%c0, %c0_0] : memref<128x128xbf16, #tpu.memory_space<vmem>>, vector<128x128xbf16>
    %c0_1 = arith.constant 0 : index
    %c0_2 = arith.constant 0 : index
    %1 = vector.load %arg1[%c0_1, %c0_2] : memref<128x128xbf16, #tpu.memory_space<vmem>>, vector<128x128xbf16>
    %cst = arith.constant dense<0.000000e+00> : vector<128x128xf32>
    %2 = tpu.matmul %0, %1, %cst {dimension_numbers = #tpu.dot_dimension_numbers<[1], [1], [0], [0], [0, 0, 1, 0], [], []>} : vector<128x128xbf16>, vector<128x128xbf16>, vector<128x128xf32> -> vector<128x128xf32>
    %c0_3 = arith.constant 0 : index
    %c0_4 = arith.constant 0 : index
    %3 = vector.load %arg3[%c0_3, %c0_4] : memref<128x1xf32, #tpu.memory_space<vmem>>, vector<128x1xf32>
    %4 = vector.broadcast %3 : vector<128x1xf32> to vector<128x128xf32>
    %5 = arith.addf %2, %4 : vector<128x128xf32>
    %6 = math.tanh %5 : vector<128x128xf32>
    %c0_5 = arith.constant 0 : index
    %c0_6 = arith.constant 0 : index
    %7 = vector.load %arg4[%c0_5, %c0_6] : memref<128x128xbf16, #tpu.memory_space<vmem>>, vector<128x128xbf16>
    %8 = arith.truncf %6 : vector<128x128xf32> to vector<128x128xbf16>
    %cst_7 = arith.constant dense<0.000000e+00> : vector<128x128xf32>
    %9 = tpu.matmul %7, %8, %cst_7 {dimension_numbers = #tpu.dot_dimension_numbers<[1], [0], [0], [1], [0, 0, 1, 1], [], []>} : vector<128x128xbf16>, vector<128x128xbf16>, vector<128x128xf32> -> vector<128x128xf32>
    %c0_8 = arith.constant 0 : index
    %c0_9 = arith.constant 0 : index
    %10 = vector.load %arg5[%c0_8, %c0_9] : memref<128x1xf32, #tpu.memory_space<vmem>>, vector<128x1xf32>
    %11 = vector.broadcast %10 : vector<128x1xf32> to vector<128x128xf32>
    %12 = arith.addf %9, %11 : vector<128x128xf32>
    %13 = math.tanh %12 : vector<128x128xf32>
    %c0_10 = arith.constant 0 : index
    %c0_11 = arith.constant 0 : index
    %14 = vector.load %arg6[%c0_10, %c0_11] : memref<128x1xf32, #tpu.memory_space<vmem>>, vector<128x1xf32>
    %15 = vector.broadcast %14 : vector<128x1xf32> to vector<128x128xf32>
    %16 = arith.mulf %13, %15 : vector<128x128xf32>
    %cst_12 = arith.constant dense<0.000000e+00> : vector<128xf32>
    %17 = vector.multi_reduction <add>, %16, %cst_12 [0] : vector<128x128xf32> to vector<128xf32>
    %18 = vector.shape_cast %17 : vector<128xf32> to vector<1x128xf32>
    %c0_13 = arith.constant 0 : index
    %19 = memref.load %arg7[%c0_13] : memref<1xf32, #tpu.memory_space<smem>>
    %20 = vector.broadcast %19 : f32 to vector<1x128xf32>
    %21 = arith.addf %18, %20 : vector<1x128xf32>
    %c0_14 = arith.constant 0 : index
    %c0_15 = arith.constant 0 : index
    %22 = vector.load %arg8[%c0_14, %c0_15] : memref<1x128xf32, #tpu.memory_space<vmem>>, vector<1x128xf32>
    tpu.vector_store %arg8[%c0_14, %c0_15], %21 {strides = array<i32>} : memref<1x128xf32, #tpu.memory_space<vmem>>, vector<1x128xf32>,
    return
  }
  func.func @transform_0(%arg0: i32) -> (i32, i32) {
    %c0_i32 = arith.constant 0 : i32
    %c0_i32_0 = arith.constant 0 : i32
    return %arg0, %c0_i32 : i32, i32
  }
  func.func @transform_1(%arg0: i32) -> (i32, i32) {
    %c0_i32 = arith.constant 0 : i32
    %c0_i32_0 = arith.constant 0 : i32
    %c0_i32_1 = arith.constant 0 : i32
    return %c0_i32, %c0_i32_0 : i32, i32
  }
  func.func @transform_2(%arg0: i32) -> (i32, i32) {
    %c0_i32 = arith.constant 0 : i32
    %c0_i32_0 = arith.constant 0 : i32
    %c0_i32_1 = arith.constant 0 : i32
    return %c0_i32, %c0_i32_0 : i32, i32
  }
  func.func @transform_3(%arg0: i32) -> (i32, i32) {
    %c0_i32 = arith.constant 0 : i32
    %c0_i32_0 = arith.constant 0 : i32
    %c0_i32_1 = arith.constant 0 : i32
    return %c0_i32, %c0_i32_0 : i32, i32
  }
  func.func @transform_4(%arg0: i32) -> (i32, i32) {
    %c0_i32 = arith.constant 0 : i32
    %c0_i32_0 = arith.constant 0 : i32
    %c0_i32_1 = arith.constant 0 : i32
    return %c0_i32, %c0_i32_0 : i32, i32
  }
  func.func @transform_5(%arg0: i32) -> (i32, i32) {
    %c0_i32 = arith.constant 0 : i32
    %c0_i32_0 = arith.constant 0 : i32
    %c0_i32_1 = arith.constant 0 : i32
    return %c0_i32, %c0_i32_0 : i32, i32
  }
  func.func @transform_6(%arg0: i32) -> i32 {
    %c0_i32 = arith.constant 0 : i32
    %c0_i32_0 = arith.constant 0 : i32
    return %c0_i32 : i32
  }
  func.func @transform_7(%arg0: i32) -> (i32, i32) {
    %c0_i32 = arith.constant 0 : i32
    %c0_i32_0 = arith.constant 0 : i32
    return %c0_i32, %arg0 : i32, i32
  }
}

</mosaic_0001>

<bundles_post_ra>
// kernel: tpu_custom_call.1
= control target key start
LH: loop header
LB: loop body
LE: loop exit
PB: predicated region body
PF: predicated region fallthrough
CT: control target
= control target key end

     0   :  { %v1034_v2 = vmov 0   ;;  %s1307_s0 = inlined_call_operand.vmem [shape: bf16[128,128], index: 0, kind: input, shape index: {}]   ;;  %s1308_s1 = inlined_call_operand.vmem [shape: bf16[128,128], index: 1, kind: input, shape index: {}]   ;;  %s1309_s2 = inlined_call_operand.vmem [shape: f32[128,1], index: 2, kind: input, shape index: {}]   ;;  %s1310_s3 = inlined_call_operand.vmem [shape: bf16[128,128], index: 3, kind: input, shape index: {}]   ;;  %s1311_s4 = inlined_call_operand.vmem [shape: f32[128,1], index: 4, kind: input, shape index: {}]   ;;  %s1312_s5 = inlined_call_operand.vmem [shape: f32[128,1], index: 5, kind: input, shape index: {}]   ;;  %s1313_s6 = inlined_call_operand.<no memory space> [shape: f32[1], index: 6, kind: input, shape index: {}]   ;;  %s1314_s7 = inlined_call_operand.hbm [shape: f32[1,128], index: 7, kind: output, shape index: {}]  }
   0x1   :  { %v922_v0 = vld [vmem:[%s1307_s0] sm:$0xff]   ;;  %v923_v1 = vld [vmem:[%s1307_s0 + $0x8] sm:$0xff]   ;;  %920 = vset.pattern.permute.xlu0 %v1034_v2  ;;  %921 = vset.pattern.permute.xlu1 %v1034_v2  ;;  %v924_v4 = vld [vmem:[%s1307_s0 + $0x10] sm:$0xff]  }
   0x2   :  { %854 = vmatprep.subr.bf16.mxu0 %v922_v0  ;;  %v61_v3 = vld [vmem:[%s1309_s2] sm:$0xff]  ;;  %v63_v5 = vld [vmem:[%s1309_s2 + $0x10] sm:$0xff]  ;;  %v62_v6 = vld [vmem:[%s1309_s2 + $0x8] sm:$0xff] }
   0x3   :  { %855 = vmatpush3.bf16.xpose.msra.mxu0 %v922_v0  ;;  %79 = vperm.xlu0 %920, %v61_v3   ;;  %v64_v7 = vld [vmem:[%s1309_s2 + $0x18] sm:$0xff]  ;;  %v930_v8 = vld [vmem:[%s1308_s1] sm:$0xff]   ;;  %v66_v10 = vld [vmem:[%s1309_s2 + $0x28] sm:$0xff] }
   0x4   :  { %856 = vmatprep.subr.bf16.mxu0 %v923_v1  ;;  %89 = vperm.xlu1 %921, %v63_v5   ;;  %v65_v9 = vld [vmem:[%s1309_s2 + $0x20] sm:$0xff]  ;;  %v925_v11 = vld [vmem:[%s1307_s0 + $0x18] sm:$0xff]   ;;  %v67_v12 = vld [vmem:[%s1309_s2 + $0x30] sm:$0xff] }
   0x5   :  { %870 = vmatprep.mubr.bf16.mxu0 %v930_v8  ;;  %v68_v13 = vld [vmem:[%s1309_s2 + $0x38] sm:$0xff]  ;;  %v69_v14 = vld [vmem:[%s1309_s2 + $0x40] sm:$0xff]  ;;  %v70_v15 = vld [vmem:[%s1309_s2 + $0x48] sm:$0xff] }
   0x6   :  { %v926_v16 = vld [vmem:[%s1307_s0 + $0x20] sm:$0xff]   ;;  %v71_v17 = vld [vmem:[%s1309_s2 + $0x50] sm:$0xff]  ;;  %v72_v18 = vld [vmem:[%s1309_s2 + $0x58] sm:$0xff] }
   0x7   :  { %84 = vperm.xlu0 %920, %v62_v6   ;;  %v73_v19 = vld [vmem:[%s1309_s2 + $0x60] sm:$0xff]  ;;  %v74_v20 = vld [vmem:[%s1309_s2 + $0x68] sm:$0xff]  ;;  %v75_v22 = vld [vmem:[%s1309_s2 + $0x70] sm:$0xff] }
   0x8   :  { %94 = vperm.xlu1 %921, %v64_v7   ;;  %v927_v21 = vld [vmem:[%s1307_s0 + $0x28] sm:$0xff]   ;;  %v76_v23 = vld [vmem:[%s1309_s2 + $0x78] sm:$0xff]  ;;  %v390_v24 = vld [vmem:[%s1311_s4] sm:$0xff] }
   0xb   :  { %857 = vmatpush3.bf16.xpose.msra.mxu0 %v923_v1  ;;  %99 = vperm.xlu0 %920, %v65_v9  }
   0xc   :  { %858 = vmatprep.subr.bf16.mxu0 %v924_v4  ;;  %104 = vperm.xlu1 %921, %v66_v10  }
   0xf   :  { %109 = vperm.xlu0 %920, %v67_v12  }
  0x10   :  { %114 = vperm.xlu1 %921, %v68_v13  }
  0x13   :  { %859 = vmatpush3.bf16.xpose.msra.mxu0 %v924_v4  ;;  %119 = vperm.xlu0 %920, %v69_v14  }
  0x14   :  { %860 = vmatprep.subr.bf16.mxu0 %v925_v11  ;;  %124 = vperm.xlu1 %921, %v70_v15  }
  0x17   :  { %129 = vperm.xlu0 %920, %v71_v17  }
  0x18   :  { %134 = vperm.xlu1 %921, %v72_v18  }
  0x1b   :  { %861 = vmatpush3.bf16.xpose.msra.mxu0 %v925_v11  ;;  %139 = vperm.xlu0 %920, %v73_v19  }
  0x1c   :  { %862 = vmatprep.subr.bf16.mxu0 %v926_v16  ;;  %144 = vperm.xlu1 %921, %v74_v20  }
  0x1f   :  { %149 = vperm.xlu0 %920, %v75_v22  }
  0x20   :  { %154 = vperm.xlu1 %921, %v76_v23  }
  0x23   :  { %863 = vmatpush3.bf16.xpose.msra.mxu0 %v926_v16 }
  0x24   :  { %864 = vmatprep.subr.bf16.mxu0 %v927_v21 }
  0x25   :  { %13 = vsyncpa [#allocation4], 0  ;;  %v391_v25 = vld [vmem:[%s1311_s4 + $0x8] sm:$0xff]  ;;  %v928_v26 = vld [vmem:[%s1307_s0 + $0x30] sm:$0xff]   ;;  %408 = vperm.xlu0 %920, %v390_v24   ;;  %s1035_s21 = smov [#allocation3]  }
  0x26   :  { %413 = vperm.xlu1 %921, %v391_v25   ;;  %v392_v27 = vld [vmem:[%s1311_s4 + $0x10] sm:$0xff]  ;;  %v393_v28 = vld [vmem:[%s1311_s4 + $0x18] sm:$0xff]  ;;  %v394_v29 = vld [vmem:[%s1311_s4 + $0x20] sm:$0xff]  ;;  %s790_s22 = sshll.u32 %s1035_s21, 4  ;;  %s791_s22 = int_to_ptr.vmem [resolvable:$true] %s790_s22 }
  0x27   :  { %v395_v30 = vld [vmem:[%s1311_s4 + $0x28] sm:$0xff]  ;;  %v929_v31 = vld [vmem:[%s1307_s0 + $0x38] sm:$0xff]   ;;  %v396_v32 = vld [vmem:[%s1311_s4 + $0x30] sm:$0xff]  ;;  %s1010_s0 = scalar_lea.vmem %s791_s22, 16  ;;  %p1015_p1 = scmp.lt.s32.totalorder %s791_s22, %s791_s22 }
  0x28   :  { %v397_v33 = vld [vmem:[%s1311_s4 + $0x38] sm:$0xff]  ;;  %v647_v34 = vld [vmem:[%s1312_s5] sm:$0xff]  ;;  %v648_v35 = vld [vmem:[%s1312_s5 + $0x8] sm:$0xff]  ;;  %p1011_p0 = scmp.ne.s32.totalorder %s791_s22, %s1010_s0 }
  0x29   :  { %418 = vperm.xlu0 %920, %v392_v27   ;;  %v398_v36 = vld [vmem:[%s1311_s4 + $0x40] sm:$0xff]  ;;  %v649_v37 = vld [vmem:[%s1312_s5 + $0x10] sm:$0xff]  ;;  %v399_v38 = vld [vmem:[%s1311_s4 + $0x48] sm:$0xff] }
  0x2a   :  { %423 = vperm.xlu1 %921, %v393_v28   ;;  %v931_v39 = vld [vmem:[%s1308_s1 + $0x8] sm:$0xff]   ;;  %v650_v40 = vld [vmem:[%s1312_s5 + $0x18] sm:$0xff]  ;;  %v932_v41 = vld [vmem:[%s1308_s1 + $0x10] sm:$0xff]  }
  0x2b   :  { %865 = vmatpush3.bf16.xpose.msra.mxu0 %v927_v21  ;;  %v400_v42 = vld [vmem:[%s1311_s4 + $0x50] sm:$0xff]  ;;  %v651_v43 = vld [vmem:[%s1312_s5 + $0x20] sm:$0xff]  ;;  %v401_v44 = vld [vmem:[%s1311_s4 + $0x58] sm:$0xff] }
  0x2c   :  { %866 = vmatprep.subr.bf16.mxu0 %v928_v26  ;;  %v933_v45 = vld [vmem:[%s1308_s1 + $0x18] sm:$0xff]   ;;  %v652_v46 = vld [vmem:[%s1312_s5 + $0x28] sm:$0xff]  ;;  %v934_v47 = vld [vmem:[%s1308_s1 + $0x20] sm:$0xff]  }
  0x2d   :  { %428 = vperm.xlu0 %920, %v394_v29   ;;  %v402_v48 = vld [vmem:[%s1311_s4 + $0x60] sm:$0xff]  ;;  %v653_v49 = vld [vmem:[%s1312_s5 + $0x30] sm:$0xff]  ;;  %v403_v50 = vld [vmem:[%s1311_s4 + $0x68] sm:$0xff] }
  0x2e   :  { %433 = vperm.xlu1 %921, %v395_v30   ;;  %v935_v51 = vld [vmem:[%s1308_s1 + $0x28] sm:$0xff]   ;;  %v654_v52 = vld [vmem:[%s1312_s5 + $0x38] sm:$0xff]  ;;  %v936_v53 = vld [vmem:[%s1308_s1 + $0x30] sm:$0xff]  }
  0x2f   :  { %v404_v54 = vld [vmem:[%s1311_s4 + $0x70] sm:$0xff]  ;;  %v655_v55 = vld [vmem:[%s1312_s5 + $0x40] sm:$0xff]  ;;  %v405_v56 = vld [vmem:[%s1311_s4 + $0x78] sm:$0xff]  ;;  %s1014_s4 = scalar_lea.vmem %s791_s22, 32 }
  0x30   :  { %v937_v57 = vld [vmem:[%s1308_s1 + $0x38] sm:$0xff]   ;;  %v656_v58 = vld [vmem:[%s1312_s5 + $0x48] sm:$0xff]  ;;  %v657_v59 = vld [vmem:[%s1312_s5 + $0x50] sm:$0xff]  ;;  %p1016_p2 = scmp.lt.s32.totalorder %s1014_s4, %s1010_s0 }
  0x31   :  { %438 = vperm.xlu0 %920, %v396_v32   ;;  %v658_v60 = vld [vmem:[%s1312_s5 + $0x58] sm:$0xff]  ;;  %v659_v61 = vld [vmem:[%s1312_s5 + $0x60] sm:$0xff]  ;;  %v660_v62 = vld [vmem:[%s1312_s5 + $0x68] sm:$0xff] }
  0x32   :  { %443 = vperm.xlu1 %921, %v397_v33   ;;  %v661_v63 = vld [vmem:[%s1312_s5 + $0x70] sm:$0xff]  ;;  %v662_v0 = vld [vmem:[%s1312_s5 + $0x78] sm:$0xff]  ;;  %v938_v1 = vld [vmem:[%s1310_s3] sm:$0xff]   ;;  %p1017_p3 = por %p1016_p2, %p1015_p1 }
  0x33   :  { %867 = vmatpush3.bf16.xpose.msra.mxu0 %v928_v26  ;;  %902 = vmatprep.mubr.bf16.mxu1 %v938_v1 }
  0x34   :  { %868 = vmatprep.subr.bf16.mxu0 %v929_v31  ;;  %p1018_p4 = pnand %p1017_p3, %p1011_p0 }
  0x35   :  { %665 = vperm.xlu0 %920, %v647_v34  }
  0x36   :  { %670 = vperm.xlu1 %921, %v648_v35  }
  0x39   :  { %448 = vperm.xlu0 %920, %v398_v36  }
  0x3a   :  { %675 = vperm.xlu1 %921, %v649_v37  }
  0x3b   :  { %869 = vmatpush3.bf16.xpose.msra.mxu0 %v929_v31 }
  0x3d   :  { %453 = vperm.xlu0 %920, %v399_v38  }
  0x3e   :  { %680 = vperm.xlu1 %921, %v650_v40  }
  0x41   :  { %458 = vperm.xlu0 %920, %v400_v42  }
  0x42   :  { %871 = vmatmul.mubr.bf16.vlgmr.msra.gmra.mrb[0].mxu0 %v931_v39  ;;  %685 = vperm.xlu1 %921, %v651_v43  }
  0x43   :  { %874 = vmatprep.mubr.bf16.mxu0 %v932_v41 }
  0x45   :  { %463 = vperm.xlu0 %920, %v401_v44  }
  0x46   :  { %690 = vperm.xlu1 %921, %v652_v46  }
  0x49   :  { %468 = vperm.xlu0 %920, %v402_v48  }
  0x4a   :  { %875 = vmatmul.mubr.bf16.gmra.mrb[4].mxu0 %v933_v45  ;;  %695 = vperm.xlu1 %921, %v653_v49  }
  0x4b   :  { %878 = vmatprep.mubr.bf16.mxu0 %v934_v47 }
  0x4d   :  { %473 = vperm.xlu0 %920, %v403_v50  }
  0x4e   :  { %700 = vperm.xlu1 %921, %v654_v52  }
  0x51   :  { %478 = vperm.xlu0 %920, %v404_v54  }
  0x52   :  { %879 = vmatmul.mubr.bf16.gmra.mrb[8].mxu0 %v935_v51  ;;  %705 = vperm.xlu1 %921, %v655_v55  }
  0x53   :  { %882 = vmatprep.mubr.bf16.mxu0 %v936_v53 }
  0x55   :  { %483 = vperm.xlu0 %920, %v405_v56  }
  0x56   :  { %710 = vperm.xlu1 %921, %v656_v58  }
  0x59   :  { %715 = vperm.xlu0 %920, %v657_v59  }
  0x5a   :  { %883 = vmatmul.mubr.bf16.gmra.mrb[12].mxu0 %v937_v57  ;;  %720 = vperm.xlu1 %921, %v658_v60  }
  0x5d   :  { %725 = vperm.xlu0 %920, %v659_v61  }
  0x5e   :  { %730 = vperm.xlu1 %921, %v660_v62  }
  0x61   :  { %735 = vperm.xlu0 %920, %v661_v63  }
  0x62   :  { %740 = vperm.xlu1 %921, %v662_v0  }
  0x82   :  { %v80_v2 = vpop.permute.xlu0 %79 }
  0x83   :  { %v90_v3 = vpop.permute.xlu1 %89 }
  0x86   :  { %v85_v4 = vpop.permute.xlu0 %84 }
  0x87   :  { %v95_v5 = vpop.permute.xlu1 %94 }
  0x8a   :  { %v100_v6 = vpop.permute.xlu0 %99 }
  0x8b   :  { %v105_v7 = vpop.permute.xlu1 %104 }
  0x8e   :  { %v110_v8 = vpop.permute.xlu0 %109 }
  0x8f   :  { %v115_v12 = vpop.permute.xlu1 %114 }
  0x92   :  { %v120_v18 = vpop.permute.xlu0 %119 }
  0x93   :  { %v125_v19 = vpop.permute.xlu1 %124 }
  0x96   :  { %v130_v27 = vpop.permute.xlu0 %129 }
  0x97   :  { %v135_v31 = vpop.permute.xlu1 %134 }
  0x9a   :  { %v140_v39 = vpop.permute.xlu0 %139 }
  0x9b   :  { %v145_v44 = vpop.permute.xlu1 %144 }
  0x9e   :  { %v150_v50 = vpop.permute.xlu0 %149 }
  0x9f   :  { %v155_v56 = vpop.permute.xlu1 %154 }
 0x115   :  { %v872_v9 = vpop.f32.mrb[0].mxu0 }
 0x116   :  { %v296_v10 = vadd.f32 %v872_v9, %v90_v3  ;;  %v287_v11 = vpop.f32.mrb[1].mxu0 }
 0x117   :  { %v288_v13 = vadd.f32 %v287_v11, %v80_v2  ;;  %v873_v14 = vpop.f32.mrb[2].mxu0  ;;  %v940_v11 = vld [vmem:[%s1310_s3 + $0x10] sm:$0xff]  }
 0x118   :  { %946 = vtanh.f32 %v296_v10  ;;  %v299_v15 = vadd.f32 %v873_v14, %v95_v5  ;;  %v290_v16 = vpop.f32.mrb[3].mxu0  ;;  %v939_v10 = vld [vmem:[%s1310_s3 + $0x8] sm:$0xff]  }
 0x119   :  { %948 = vtanh.f32 %v288_v13  ;;  %v291_v17 = vadd.f32 %v290_v16, %v85_v4  ;;  %v942_v13 = vld [vmem:[%s1310_s3 + $0x20] sm:$0xff]   ;;  %v943_v14 = vld [vmem:[%s1310_s3 + $0x28] sm:$0xff]   ;;  %v945_v16 = vld [vmem:[%s1310_s3 + $0x38] sm:$0xff]  }
 0x11a   :  { %950 = vtanh.f32 %v299_v15  ;;  %v944_v15 = vld [vmem:[%s1310_s3 + $0x30] sm:$0xff]  }
 0x11b   :  { %952 = vtanh.f32 %v291_v17  ;;  %v409_v17 = vpop.permute.xlu0 %408 }
 0x11d   :  { %v876_v20 = vpop.f32.mrb[4].mxu0 }
 0x11e   :  { %v312_v21 = vadd.f32 %v876_v20, %v110_v8  ;;  %v303_v22 = vpop.f32.mrb[5].mxu0 }
 0x11f   :  { %v304_v23 = vadd.f32 %v303_v22, %v100_v6  ;;  %v877_v24 = vpop.f32.mrb[6].mxu0 }
 0x120   :  { %954 = vtanh.f32 %v312_v21  ;;  %v315_v25 = vadd.f32 %v877_v24, %v115_v12  ;;  %v306_v26 = vpop.f32.mrb[7].mxu0  ;;  %v941_v12 = vld [vmem:[%s1310_s3 + $0x18] sm:$0xff]  }
 0x121   :  { %956 = vtanh.f32 %v304_v23  ;;  %v307_v28 = vadd.f32 %v306_v26, %v105_v7 }
 0x122   :  { %v947_v29 = vpop.eup %946  ;;  %958 = vtanh.f32 %v315_v25 }
 0x123   :  { %v949_v30 = vpop.eup %948  ;;  %960 = vtanh.f32 %v307_v28 }
 0x124   :  { %v951_v32 = vpop.eup %950 }
 0x125   :  { %v953_v33 = vpop.eup %952  ;;  %v880_v34 = vpop.f32.mrb[8].mxu0  ;;  %v383_v35 = vpack.c.bf16 %v951_v32, %v947_v29 }
 0x126   :  { %v328_v36 = vadd.f32 %v880_v34, %v130_v27  ;;  %v319_v37 = vpop.f32.mrb[9].mxu0  ;;  %v382_v38 = vpack.c.bf16 %v953_v33, %v949_v30 }
 0x127   :  { %v320_v40 = vadd.f32 %v319_v37, %v120_v18  ;;  %v881_v41 = vpop.f32.mrb[10].mxu0  ;;  %v414_v18 = vpop.permute.xlu1 %413 }
 0x128   :  { %962 = vtanh.f32 %v328_v36  ;;  %v331_v42 = vadd.f32 %v881_v41, %v135_v31  ;;  %v322_v43 = vpop.f32.mrb[11].mxu0  ;;  %886 = vmatprep.subr.bf16.mxu1 %v382_v38 }
 0x129   :  { %964 = vtanh.f32 %v320_v40  ;;  %v323_v45 = vadd.f32 %v322_v43, %v125_v19  ;;  %887 = vmatpush3.bf16.msra.mxu1 %v382_v38  ;;  %v419_v19 = vpop.permute.xlu0 %418 }
 0x12a   :  { %v955_v46 = vpop.eup %954  ;;  %966 = vtanh.f32 %v331_v42  ;;  %888 = vmatprep.subr.bf16.mxu1 %v383_v35 }
 0x12b   :  { %v957_v47 = vpop.eup %956  ;;  %968 = vtanh.f32 %v323_v45  ;;  %v424_v20 = vpop.permute.xlu1 %423 }
 0x12c   :  { %v959_v48 = vpop.eup %958 }
 0x12d   :  { %v961_v49 = vpop.eup %960  ;;  %v884_v51 = vpop.f32.mrb[12].mxu0  ;;  %889 = vmatpush3.bf16.msra.mxu1 %v383_v35  ;;  %v385_v52 = vpack.c.bf16 %v959_v48, %v955_v46 }
 0x12e   :  { %v344_v53 = vadd.f32 %v884_v51, %v150_v50  ;;  %v335_v54 = vpop.f32.mrb[13].mxu0  ;;  %v384_v55 = vpack.c.bf16 %v961_v49, %v957_v47  ;;  %v429_v21 = vpop.permute.xlu0 %428 }
 0x12f   :  { %v336_v57 = vadd.f32 %v335_v54, %v140_v39  ;;  %v885_v58 = vpop.f32.mrb[14].mxu0  ;;  %v434_v22 = vpop.permute.xlu1 %433 }
 0x130   :  { %970 = vtanh.f32 %v344_v53  ;;  %v347_v59 = vadd.f32 %v885_v58, %v155_v56  ;;  %v338_v60 = vpop.f32.mrb[15].mxu0  ;;  %890 = vmatprep.subr.bf16.mxu1 %v384_v55 }
 0x131   :  { %972 = vtanh.f32 %v336_v57  ;;  %v339_v61 = vadd.f32 %v338_v60, %v145_v44  ;;  %891 = vmatpush3.bf16.msra.mxu1 %v384_v55 }
 0x132   :  { %v963_v62 = vpop.eup %962  ;;  %974 = vtanh.f32 %v347_v59  ;;  %892 = vmatprep.subr.bf16.mxu1 %v385_v52  ;;  %v439_v23 = vpop.permute.xlu0 %438 }
 0x133   :  { %v965_v63 = vpop.eup %964  ;;  %976 = vtanh.f32 %v339_v61  ;;  %v444_v24 = vpop.permute.xlu1 %443 }
 0x134   :  { %v967_v0 = vpop.eup %966 }
 0x135   :  { %v969_v1 = vpop.eup %968  ;;  %893 = vmatpush3.bf16.msra.mxu1 %v385_v52  ;;  %v387_v2 = vpack.c.bf16 %v967_v0, %v963_v62 }
 0x136   :  { %v386_v3 = vpack.c.bf16 %v969_v1, %v965_v63  ;;  %v666_v25 = vpop.permute.xlu0 %665 }
 0x137   :  { %v671_v26 = vpop.permute.xlu1 %670 }
 0x138   :  { %894 = vmatprep.subr.bf16.mxu1 %v386_v3 }
 0x139   :  { %895 = vmatpush3.bf16.msra.mxu1 %v386_v3 }
 0x13a   :  { %v971_v4 = vpop.eup %970  ;;  %896 = vmatprep.subr.bf16.mxu1 %v387_v2  ;;  %v449_v27 = vpop.permute.xlu0 %448 }
 0x13b   :  { %v973_v5 = vpop.eup %972  ;;  %v676_v28 = vpop.permute.xlu1 %675 }
 0x13c   :  { %v975_v6 = vpop.eup %974 }
 0x13d   :  { %v977_v7 = vpop.eup %976  ;;  %897 = vmatpush3.bf16.msra.mxu1 %v387_v2  ;;  %v389_v8 = vpack.c.bf16 %v975_v6, %v971_v4 }
 0x13e   :  { %v388_v9 = vpack.c.bf16 %v977_v7, %v973_v5  ;;  %v454_v29 = vpop.permute.xlu0 %453 }
 0x13f   :  { %v681_v30 = vpop.permute.xlu1 %680 }
 0x140   :  { %898 = vmatprep.subr.bf16.mxu1 %v388_v9 }
 0x141   :  { %899 = vmatpush3.bf16.msra.mxu1 %v388_v9 }
 0x142   :  { %900 = vmatprep.subr.bf16.mxu1 %v389_v8  ;;  %v459_v31 = vpop.permute.xlu0 %458 }
 0x143   :  { %v686_v32 = vpop.permute.xlu1 %685 }
 0x145   :  { %901 = vmatpush3.bf16.msra.mxu1 %v389_v8 }
 0x146   :  { %v464_v33 = vpop.permute.xlu0 %463 }
 0x147   :  { %v691_v37 = vpop.permute.xlu1 %690 }
 0x148   :  { %903 = vmatmul.mubr.bf16.vlgmr.msra.gmra.mrb[0].mxu1 %v939_v10 }
 0x149   :  { %906 = vmatprep.mubr.bf16.mxu1 %v940_v11 }
 0x14a   :  { %v469_v43 = vpop.permute.xlu0 %468 }
 0x14b   :  { %v696_v44 = vpop.permute.xlu1 %695 }
 0x14e   :  { %v474_v51 = vpop.permute.xlu0 %473 }
 0x14f   :  { %v701_v55 = vpop.permute.xlu1 %700 }
 0x150   :  { %907 = vmatmul.mubr.bf16.gmra.mrb[4].mxu1 %v941_v12 }
 0x151   :  { %910 = vmatprep.mubr.bf16.mxu1 %v942_v13 }
 0x152   :  { %v479_v0 = vpop.permute.xlu0 %478 }
 0x153   :  { %v706_v6 = vpop.permute.xlu1 %705 }
 0x158   :  { %911 = vmatmul.mubr.bf16.gmra.mrb[8].mxu1 %v943_v14 }
 0x159   :  { %914 = vmatprep.mubr.bf16.mxu1 %v944_v15 }
 0x160   :  { %915 = vmatmul.mubr.bf16.gmra.mrb[12].mxu1 %v945_v16  ;;  %v484_v16 = vpop.permute.xlu0 %483 }
 0x21b   :  { %v904_v34 = vpop.f32.mrb[0].mxu1 }
 0x21c   :  { %v577_v35 = vadd.f32 %v904_v34, %v419_v19  ;;  %v568_v36 = vpop.f32.mrb[1].mxu1  ;;  %v716_v34 = vpop.permute.xlu0 %715 }
 0x21d   :  { %v569_v38 = vadd.f32 %v568_v36, %v409_v17  ;;  %v905_v39 = vpop.f32.mrb[2].mxu1 }
 0x21e   :  { %v571_v40 = vpop.f32.mrb[3].mxu1  ;;  %v580_v41 = vadd.f32 %v905_v39, %v424_v20 }
 0x21f   :  { %978 = vtanh.f32 %v569_v38  ;;  %v572_v42 = vadd.f32 %v571_v40, %v414_v18 }
 0x220   :  { %980 = vtanh.f32 %v577_v35 }
 0x221   :  { %982 = vtanh.f32 %v572_v42 }
 0x222   :  { %984 = vtanh.f32 %v580_v41 }
 0x223   :  { %v908_v45 = vpop.f32.mrb[4].mxu1 }
 0x224   :  { %v593_v46 = vadd.f32 %v908_v45, %v439_v23  ;;  %v584_v47 = vpop.f32.mrb[5].mxu1  ;;  %v711_v23 = vpop.permute.xlu1 %710 }
 0x225   :  { %v585_v48 = vadd.f32 %v584_v47, %v429_v21  ;;  %v909_v49 = vpop.f32.mrb[6].mxu1  ;;  %v726_v45 = vpop.permute.xlu0 %725 }
 0x226   :  { %v587_v50 = vpop.f32.mrb[7].mxu1  ;;  %v596_v52 = vadd.f32 %v909_v49, %v444_v24 }
 0x227   :  { %986 = vtanh.f32 %v585_v48  ;;  %v588_v53 = vadd.f32 %v587_v50, %v434_v22 }
 0x228   :  { %988 = vtanh.f32 %v593_v46  ;;  %v721_v39 = vpop.permute.xlu1 %720 }
 0x229   :  { %v979_v54 = vpop.eup %978  ;;  %990 = vtanh.f32 %v588_v53 }
 0x22a   :  { %v981_v56 = vpop.eup %980  ;;  %992 = vtanh.f32 %v596_v52  ;;  %v743_v59 = vmul.f32 %v979_v54, %v666_v25 }
 0x22b   :  { %v983_v57 = vpop.eup %982  ;;  %v912_v58 = vpop.f32.mrb[8].mxu1  ;;  %v745_v3 = vmul.f32 %v981_v56, %v676_v28 }
 0x22c   :  { %v744_v60 = vmul.f32 %v983_v57, %v671_v26  ;;  %v609_v61 = vadd.f32 %v912_v58, %v459_v31  ;;  %v600_v62 = vpop.f32.mrb[9].mxu1  ;;  %v985_v63 = vpop.eup %984 }
 0x22d   :  { %v601_v1 = vadd.f32 %v600_v62, %v449_v27  ;;  %v913_v2 = vpop.f32.mrb[10].mxu1  ;;  %v746_v9 = vmul.f32 %v985_v63, %v681_v30  ;;  %v731_v49 = vpop.permute.xlu1 %730 }
 0x22e   :  { %v759_v4 = vadd.f32 %v744_v60, %v743_v59  ;;  %v603_v5 = vpop.f32.mrb[11].mxu1  ;;  %v612_v7 = vadd.f32 %v913_v2, %v464_v33  ;;  %v736_v57 = vpop.permute.xlu0 %735 }
 0x22f   :  { %994 = vtanh.f32 %v601_v1  ;;  %v604_v8 = vadd.f32 %v603_v5, %v454_v29  ;;  %v781_v5 = vstv %s1313_s6 }
 0x230   :  { %v760_v10 = vadd.f32 %v759_v4, %v745_v3  ;;  %996 = vtanh.f32 %v609_v61 }
 0x231   :  { %v987_v11 = vpop.eup %986  ;;  %998 = vtanh.f32 %v604_v8  ;;  %v741_v60 = vpop.permute.xlu1 %740 }
 0x232   :  { %v989_v12 = vpop.eup %988  ;;  %v747_v13 = vmul.f32 %v987_v11, %v686_v32  ;;  %v761_v14 = vadd.f32 %v760_v10, %v746_v9  ;;  %1000 = vtanh.f32 %v612_v7 }
 0x233   :  { %v991_v15 = vpop.eup %990  ;;  %v916_v17 = vpop.f32.mrb[12].mxu1  ;;  %v749_v26 = vmul.f32 %v989_v12, %v696_v44 }
 0x234   :  { %v762_v18 = vadd.f32 %v761_v14, %v747_v13  ;;  %v748_v19 = vmul.f32 %v991_v15, %v691_v37  ;;  %v625_v20 = vadd.f32 %v916_v17, %v479_v0  ;;  %v616_v21 = vpop.f32.mrb[13].mxu1  ;;  %v993_v22 = vpop.eup %992 }
 0x235   :  { %v617_v24 = vadd.f32 %v616_v21, %v469_v43  ;;  %v917_v25 = vpop.f32.mrb[14].mxu1  ;;  %v750_v31 = vmul.f32 %v993_v22, %v701_v55 }
 0x236   :  { %v763_v27 = vadd.f32 %v762_v18, %v748_v19  ;;  %v619_v28 = vpop.f32.mrb[15].mxu1  ;;  %v628_v29 = vadd.f32 %v917_v25, %v484_v16 }
 0x237   :  { %1002 = vtanh.f32 %v617_v24  ;;  %v620_v30 = vadd.f32 %v619_v28, %v474_v51 }
 0x238   :  { %v764_v32 = vadd.f32 %v763_v27, %v749_v26  ;;  %1004 = vtanh.f32 %v625_v20 }
 0x239   :  { %v995_v33 = vpop.eup %994  ;;  %1006 = vtanh.f32 %v620_v30 }
 0x23a   :  { %v997_v35 = vpop.eup %996  ;;  %v751_v36 = vmul.f32 %v995_v33, %v706_v6  ;;  %v765_v37 = vadd.f32 %v764_v32, %v750_v31  ;;  %1008 = vtanh.f32 %v628_v29 }
 0x23b   :  { %v999_v38 = vpop.eup %998  ;;  %v753_v43 = vmul.f32 %v997_v35, %v716_v34 }
 0x23c   :  { %v766_v40 = vadd.f32 %v765_v37, %v751_v36  ;;  %v752_v41 = vmul.f32 %v999_v38, %v711_v23  ;;  %v1001_v42 = vpop.eup %1000 }
 0x23d   :  { %v754_v46 = vmul.f32 %v1001_v42, %v721_v39 }
 0x23e   :  { %v767_v44 = vadd.f32 %v766_v40, %v752_v41 }
 0x240   :  { %v768_v47 = vadd.f32 %v767_v44, %v753_v43 }
 0x241   :  { %v1003_v48 = vpop.eup %1002 }
 0x242   :  { %v1005_v50 = vpop.eup %1004  ;;  %v755_v51 = vmul.f32 %v1003_v48, %v726_v45  ;;  %v769_v52 = vadd.f32 %v768_v47, %v754_v46 }
 0x243   :  { %v1007_v53 = vpop.eup %1006  ;;  %v757_v58 = vmul.f32 %v1005_v50, %v736_v57 }
 0x244   :  { %v770_v54 = vadd.f32 %v769_v52, %v755_v51  ;;  %v756_v55 = vmul.f32 %v1007_v53, %v731_v49  ;;  %v1009_v56 = vpop.eup %1008 }
 0x245   :  { %v758_v61 = vmul.f32 %v1009_v56, %v741_v60 }
 0x246   :  { %v771_v59 = vadd.f32 %v770_v54, %v756_v55 }
 0x248   :  { %v772_v62 = vadd.f32 %v771_v59, %v757_v58 }
 0x24a   :  { %v773_v63 = vadd.f32 %v772_v62, %v758_v61 }
 0x24c   :  { %v774_v0 = vrot.slane %v773_v63, 4 }
 0x24e   :  { %v775_v1 = vadd.f32 %v774_v0, %v773_v63 }
 0x250   :  { %v776_v2 = vrot.slane %v775_v1, 2 }
 0x252   :  { %v777_v3 = vadd.f32 %v776_v2, %v775_v1 }
 0x254   :  { %v778_v4 = vrot.slane %v777_v3, 1 }
 0x256   :  { %v779_v6 = vadd.f32 %v778_v4, %v777_v3 }
 0x258   :  { %v782_v7 = vadd.f32 %v781_v5, %v779_v6 }
 0x25a   :  { %783 = vst [vmem:[#allocation3] sm:$0x1] %v782_v7 }
 0x25b   :  { %1021 = shalt.err (!%p1018_p4)
}
 0x25c   :  { %s1022_s24 = scalar_lea.hbm %s1314_s7, 16 }
 0x25d   :  { %p1023_p5 = scmp.ne.s32.totalorder %s1314_s7, %s1022_s24  ;;  %p1026_p6 = scmp.lt.u32.totalorder %s1022_s24, %s1314_s7 }
 0x25f   :  { %p1028_p7 = pnand %p1026_p6, %p1023_p5 }
 0x261   :  { %1031 = shalt.err (!%p1028_p7)
}
 0x262   :  { %793 = dma.vmem_to_hbm [thread:$0]  %s791_s22, 16, %s1314_s7, [#allocation4]  }
 0x263   :  { %1032 = dma.done.wait [#allocation4], 16  }
 0x264   :  { %1033 = vsyncadd [#allocation4], 4294967280 }
 0x265   :  { %797 = vsyncpa [#allocation4], 1 }

</bundles_post_ra>
